<compile_context>
chip_gen: v6e
topology: v6e:2x2x1
jax: 0.10.0
libtpu: 0.0.40
codegen_flags: <defaults>
</compile_context>

<pallas_src>
import functools
import math

import jax
import jax.numpy as jnp
from jax import lax
from jax.experimental import pallas as pl
from jax.experimental.pallas import tpu as pltpu


def _dot_nt(a, b):
    # a @ b.T without an explicit in-kernel transpose (contract last dims).
    return lax.dot_general(a, b, (((1,), (1,)), ((), ())),
                           preferred_element_type=jnp.float32)


def _mha_kernel(bias_ref, xq_ref, xk_ref, asp_ref,
                wq_ref, bq_ref, wk_ref, bk_ref, wd_ref, bd_ref,
                short_ref, mask_ref, out_ref,
                k_scr, asp_scr, *, h, d_k):
    # Grid = (batch, query_tile).  Per step:
    #   xq     : (TQ, d_model)  raw query activations for this tile
    #   xk     : (S,  d_model)  raw key activations (resident per batch)
    #   asp    : (1,  d_model)
    #   wq/wk  : (d_model, d_model) bf16, x @ W form; 1/sqrt(d_k) folded into wq
    #   bq/bk  : (1, d_model) f32 ; wd: (d_model, d_k), bd: (1, d_k)
    #   short  : (h, TQ, S),  mask: (TQ, S) raw {0,1} mask
    #   out    : (h, TQ, S)
    #   k_scr  : (S, d_model) bf16 scratch  (projected keys, per batch)
    #   asp_scr: (h, 1, S)    f32  scratch  (tanh aspect rows, per batch)
    qi = pl.program_id(1)

    # ---- once per batch: full-width key projection + per-head aspect rows ----
    @pl.when(qi == 0)
    def _():
        xk = xk_ref[...].astype(jnp.bfloat16)
        k_all = (jnp.dot(xk, wk_ref[...], preferred_element_type=jnp.float32)
                 + bk_ref[...])                                   # (S, d_model) f32
        k_scr[...] = k_all.astype(k_scr.dtype)
        # Aspect projection (dense: d_model -> d_k); identical for every head
        # and every query row, so compute the (1, S) tanh row once per head
        # per batch and broadcast it when forming the scores.
        asp = (jnp.dot(asp_ref[...], wd_ref[...],
                       preferred_element_type=jnp.float32)
               + bd_ref[...])                                     # (1, d_k)
        for hh in range(h):
            kh = k_all[:, hh * d_k:(hh + 1) * d_k]                # (S, d_k)
            asp_scr[hh] = jnp.tanh(_dot_nt(asp, kh) + bias_ref[0])  # (1, S)

    # ---- per query tile: one full-width Q projection for ALL heads ----------
    xq = xq_ref[...].astype(jnp.bfloat16)
    q_all = (jnp.dot(xq, wq_ref[...], preferred_element_type=jnp.float32)
             + bq_ref[...]).astype(jnp.bfloat16)   # (TQ, d_model); scale folded

    # Additive mask bias, computed in-kernel once per step, shared across heads.
    # (Identical to masked_fill whenever a query row keeps >=1 key.)
    maskb = jnp.where(mask_ref[...] == 0.0, jnp.float32(-1e9), jnp.float32(0.0))

    k_all_b = k_scr[...]                            # (S, d_model) bf16
    for hh in range(h):
        qh = q_all[:, hh * d_k:(hh + 1) * d_k]      # (TQ, d_k) bf16
        kh = k_all_b[:, hh * d_k:(hh + 1) * d_k]    # (S,  d_k) bf16
        scores = _dot_nt(qh, kh)                    # (TQ, S) f32, pre-scaled
        scores = scores + asp_scr[hh] + maskb + short_ref[hh]
        # softmax over the key axis (f32)
        m = jnp.max(scores, axis=-1, keepdims=True)
        e = jnp.exp(scores - m)
        denom = jnp.sum(e, axis=-1, keepdims=True)
        out_ref[hh] = e * pl.reciprocal(denom, approx=True)


def multi_head_attention_forward(params, query, key, short, aspect, mask):
    B, S, d_model = query.shape
    h = int(params["h"])
    d_k = d_model // h
    mask = mask[:, :, :S]                            # matches the torch slice

    # One-time, tiny XLA prep of the *parameters* only:
    #  - transpose to x @ W form,
    #  - fold 1/sqrt(d_k) into the query projection,
    #  - cast the big matmul weights to bf16 (MXU native on v5e/v6e/v7x).
    inv_sqrt_dk = 1.0 / math.sqrt(d_k)
    wq_t = (params["wq"].T * inv_sqrt_dk).astype(jnp.bfloat16)   # (d_model, d_model)
    bq = (params["bq"] * inv_sqrt_dk).reshape(1, d_model).astype(jnp.float32)
    wk_t = params["wk"].T.astype(jnp.bfloat16)                   # (d_model, d_model)
    bk = params["bk"].reshape(1, d_model).astype(jnp.float32)
    wd_t = params["wd"].T.astype(jnp.float32)                    # (d_model, d_k)
    bd = params["bd"].reshape(1, d_k).astype(jnp.float32)
    asp = aspect.reshape(B, 1, d_model)

    # Query-axis tile bounds the (h, TQ, S) short/out blocks' VMEM footprint at
    # production S (v7x has only 64 MiB/TC; 32 MiB scoped default elsewhere).
    TQ = min(S, 256)
    if S % TQ != 0:
        TQ = S
    n_q = S // TQ

    kernel = functools.partial(_mha_kernel, h=h, d_k=d_k)

    out = pl.pallas_call(
        kernel,
        out_shape=jax.ShapeDtypeStruct((B, h, S, S), jnp.float32),
        grid=(B, n_q),
        in_specs=[
            pl.BlockSpec(memory_space=pltpu.MemorySpace.SMEM),          # bias_m (1,)
            pl.BlockSpec((None, TQ, d_model), lambda b, q: (b, q, 0)),  # query tile
            pl.BlockSpec((None, S, d_model), lambda b, q: (b, 0, 0)),   # key (per batch)
            pl.BlockSpec((None, 1, d_model), lambda b, q: (b, 0, 0)),   # aspect
            # Grid-invariant weights (never re-DMA'd).  On v7x, consider
            # pipeline_mode=pl.Buffered(1) here to reclaim the second buffer.
            pl.BlockSpec((d_model, d_model), lambda b, q: (0, 0)),      # wq (scaled)
            pl.BlockSpec((1, d_model), lambda b, q: (0, 0)),            # bq (scaled)
            pl.BlockSpec((d_model, d_model), lambda b, q: (0, 0)),      # wk
            pl.BlockSpec((1, d_model), lambda b, q: (0, 0)),            # bk
            pl.BlockSpec((d_model, d_k), lambda b, q: (0, 0)),          # wd
            pl.BlockSpec((1, d_k), lambda b, q: (0, 0)),                # bd
            pl.BlockSpec((None, h, TQ, S), lambda b, q: (b, 0, q, 0)),  # short
            pl.BlockSpec((None, TQ, S), lambda b, q: (b, q, 0)),        # mask (raw)
        ],
        out_specs=pl.BlockSpec((None, h, TQ, S), lambda b, q: (b, 0, q, 0)),
        scratch_shapes=[
            pltpu.VMEM((S, d_model), jnp.bfloat16),   # projected keys, per batch
            pltpu.VMEM((h, 1, S), jnp.float32),       # per-head tanh aspect rows
        ],
        compiler_params=pltpu.CompilerParams(
            # batch axis shards across TensorCores (v7x); query-tile axis is
            # sequential so the per-batch key/aspect scratch carries over.
            dimension_semantics=("parallel", "arbitrary"),
            # v5e's scoped default is only 16 MiB; size for weights + blocks.
            vmem_limit_bytes=32 * 1024 * 1024,
        ),
    )(params["bias_m"], query, key, asp, wq_t, bq, wk_t, bk, wd_t, bd,
      short, mask)
    return out


def _reference_forward(params, query, key, short, aspect, mask):
    """Pure-JAX replica of the PyTorch forward (eval mode), for verification."""
    B, S, d_model = query.shape
    h = int(params["h"])
    d_k = d_model // h
    q = (query @ params["wq"].T + params["bq"]).reshape(B, S, h, d_k).transpose(0, 2, 1, 3)
    k = (key @ params["wk"].T + params["bk"]).reshape(B, S, h, d_k).transpose(0, 2, 1, 3)
    asp = aspect @ params["wd"].T + params["bd"]
    asp = jnp.broadcast_to(asp[:, None, None, :], (B, h, S, d_k))
    scores = jnp.einsum("bhqd,bhkd->bhqk", q, k) / math.sqrt(d_k)
    aspect_scores = jnp.tanh(jnp.einsum("bhqd,bhkd->bhqk", asp, k) + params["bias_m"][0])
    scores = scores + aspect_scores
    scores = jnp.where(mask[:, None, :, :] == 0.0, -1e9, scores)
    scores = scores + short
    return jax.nn.softmax(scores, axis=-1)


def _init_params(rng, h, d_model):
    d_k = d_model // h
    keys = jax.random.split(rng, 8)
    s = 1.0 / math.sqrt(d_model)
    params = {
        "h": h,
        "wq": jax.random.uniform(keys[0], (d_model, d_model), jnp.float32, -s, s),
        "bq": jax.random.uniform(keys[1], (d_model,), jnp.float32, -s, s),
        "wk": jax.random.uniform(keys[2], (d_model, d_model), jnp.float32, -s, s),
        "bk": jax.random.uniform(keys[3], (d_model,), jnp.float32, -s, s),
        "wd": jax.random.uniform(keys[4], (d_k, d_model), jnp.float32, -s, s),
        "bd": jax.random.uniform(keys[5], (d_k,), jnp.float32, -s, s),
        "bias_m": jax.random.uniform(keys[6], (1,), jnp.float32, -0.1, 0.1),
        # weight_m exists in the module but is unused by forward:
        "weight_m": jax.random.normal(keys[7], (h, d_k, d_k), jnp.float32),
    }
    return params


if __name__ == "__main__":
    B, S, d_model, h = 2, 8, 32, 4

    root = jax.random.PRNGKey(0)
    k_par, k_q, k_k, k_s, k_a, k_m = jax.random.split(root, 6)

    params = _init_params(k_par, h, d_model)
    query = jax.random.normal(k_q, (B, S, d_model), jnp.float32)
    key_in = jax.random.normal(k_k, (B, S, d_model), jnp.float32)
    short = jax.random.normal(k_s, (B, h, S, S), jnp.float32)
    aspect = jax.random.normal(k_a, (B, d_model), jnp.float32)
    mask = jax.random.bernoulli(k_m, 0.8, (B, S, S)).astype(jnp.float32)
    # Ensure every query row keeps at least one key (true of any real attention
    # mask); with that, the additive mask bias matches masked_fill exactly.
    mask = mask.at[:, :, 0].set(1.0)

    out = multi_head_attention_forward(params, query, key_in, short, aspect, mask)
    out = jax.block_until_ready(out)

    ref = _reference_forward(params, query, key_in, short, aspect, mask)
    assert out.shape == (B, h, S, S)
    # Tolerance relaxed vs. the f32-only version: bf16 MXU operands plus the
    # approx (EUP) reciprocal in the softmax introduce ~1% relative error.
    assert jnp.allclose(out, ref, atol=3e-2, rtol=3e-2), "mismatch vs reference"

    print("KERNEL_OK")
</pallas_src>

<mosaic_0001>
module attributes {stable_mosaic.version = 11 : i64} {
  func.func @_mha_kernel(%arg0: i32, %arg1: i32, %arg2: memref<1xf32, #tpu.memory_space<smem>>, %arg3: memref<1x8x32xf32, #tpu.memory_space<vmem>>, %arg4: memref<1x8x32xf32, #tpu.memory_space<vmem>>, %arg5: memref<1x1x32xf32, #tpu.memory_space<vmem>>, %arg6: memref<32x32xbf16, #tpu.memory_space<vmem>>, %arg7: memref<1x32xf32, #tpu.memory_space<vmem>>, %arg8: memref<32x32xbf16, #tpu.memory_space<vmem>>, %arg9: memref<1x32xf32, #tpu.memory_space<vmem>>, %arg10: memref<32x8xf32, #tpu.memory_space<vmem>>, %arg11: memref<1x8xf32, #tpu.memory_space<vmem>>, %arg12: memref<1x4x8x8xf32, #tpu.memory_space<vmem>>, %arg13: memref<1x8x8xf32, #tpu.memory_space<vmem>>, %arg14: memref<1x4x8x8xf32, #tpu.memory_space<vmem>>, %arg15: memref<8x32xbf16, #tpu.memory_space<vmem>>, %arg16: memref<4x1x8xf32, #tpu.memory_space<vmem>>) attributes {dimension_semantics = [#tpu.dimension_semantics<parallel>, #tpu.dimension_semantics<arbitrary>], iteration_bounds = array<i64: 2, 1>, scalar_prefetch = 0 : i64, scratch_operands = 2 : i64, tpu.core_type = #tpu.core_type<tc>, window_params = [{transform_indices = @transform_0, window_bounds = array<i64: 1>}, {transform_indices = @transform_1, window_bounds = array<i64: 1, 8, 32>}, {transform_indices = @transform_2, window_bounds = array<i64: 1, 8, 32>}, {transform_indices = @transform_3, window_bounds = array<i64: 1, 1, 32>}, {pipeline_mode = #tpu.pipeline_mode<synchronous>, transform_indices = @transform_4, window_bounds = array<i64: 32, 32>}, {pipeline_mode = #tpu.pipeline_mode<synchronous>, transform_indices = @transform_5, window_bounds = array<i64: 1, 32>}, {pipeline_mode = #tpu.pipeline_mode<synchronous>, transform_indices = @transform_6, window_bounds = array<i64: 32, 32>}, {pipeline_mode = #tpu.pipeline_mode<synchronous>, transform_indices = @transform_7, window_bounds = array<i64: 1, 32>}, {pipeline_mode = #tpu.pipeline_mode<synchronous>, transform_indices = @transform_8, window_bounds = array<i64: 32, 8>}, {pipeline_mode = #tpu.pipeline_mode<synchronous>, transform_indices = @transform_9, window_bounds = array<i64: 1, 8>}, {transform_indices = @transform_10, window_bounds = array<i64: 1, 4, 8, 8>}, {transform_indices = @transform_11, window_bounds = array<i64: 1, 8, 8>}, {transform_indices = @transform_12, window_bounds = array<i64: 1, 4, 8, 8>}]} {
    %c0_i32 = arith.constant 0 : i32
    %0 = arith.cmpi eq, %arg1, %c0_i32 : i32
    %1 = arith.extui %0 : i1 to i32
    %c0_i32_0 = arith.constant 0 : i32
    %2 = arith.cmpi ne, %1, %c0_i32_0 : i32
    scf.if %2 {
      %c0_68 = arith.constant 0 : index
      %c0_69 = arith.constant 0 : index
      %c0_70 = arith.constant 0 : index
      %116 = vector.load %arg4[%c0_68, %c0_69, %c0_70] : memref<1x8x32xf32, #tpu.memory_space<vmem>>, vector<1x8x32xf32>
      %117 = vector.shape_cast %116 : vector<1x8x32xf32> to vector<8x32xf32>
      %118 = arith.truncf %117 : vector<8x32xf32> to vector<8x32xbf16>
      %c0_71 = arith.constant 0 : index
      %c0_72 = arith.constant 0 : index
      %119 = vector.load %arg8[%c0_71, %c0_72] : memref<32x32xbf16, #tpu.memory_space<vmem>>, vector<32x32xbf16>
      %cst_73 = arith.constant dense<0.000000e+00> : vector<8x32xf32>
      %120 = tpu.matmul %118, %119, %cst_73 {dimension_numbers = #tpu.dot_dimension_numbers<[1], [0], [0], [1], [0, 0, 1, 1], [], []>} : vector<8x32xbf16>, vector<32x32xbf16>, vector<8x32xf32> -> vector<8x32xf32>
      %c0_74 = arith.constant 0 : index
      %c0_75 = arith.constant 0 : index
      %121 = vector.load %arg9[%c0_74, %c0_75] : memref<1x32xf32, #tpu.memory_space<vmem>>, vector<1x32xf32>
      %122 = vector.broadcast %121 : vector<1x32xf32> to vector<8x32xf32>
      %123 = arith.addf %120, %122 : vector<8x32xf32>
      %124 = arith.truncf %123 : vector<8x32xf32> to vector<8x32xbf16>
      %c0_76 = arith.constant 0 : index
      %c0_77 = arith.constant 0 : index
      %125 = vector.load %arg15[%c0_76, %c0_77] : memref<8x32xbf16, #tpu.memory_space<vmem>>, vector<8x32xbf16>
      tpu.vector_store %arg15[%c0_76, %c0_77], %124 {strides = array<i32>} : memref<8x32xbf16, #tpu.memory_space<vmem>>, vector<8x32xbf16>,
      %c0_78 = arith.constant 0 : index
      %c0_79 = arith.constant 0 : index
      %c0_80 = arith.constant 0 : index
      %126 = vector.load %arg5[%c0_78, %c0_79, %c0_80] : memref<1x1x32xf32, #tpu.memory_space<vmem>>, vector<1x1x32xf32>
      %127 = vector.shape_cast %126 : vector<1x1x32xf32> to vector<1x32xf32>
      %c0_81 = arith.constant 0 : index
      %c0_82 = arith.constant 0 : index
      %128 = vector.load %arg10[%c0_81, %c0_82] : memref<32x8xf32, #tpu.memory_space<vmem>>, vector<32x8xf32>
      %cst_83 = arith.constant dense<0.000000e+00> : vector<1x8xf32>
      %129 = tpu.matmul %127, %128, %cst_83 {dimension_numbers = #tpu.dot_dimension_numbers<[1], [0], [0], [1], [0, 0, 1, 1], [], []>} : vector<1x32xf32>, vector<32x8xf32>, vector<1x8xf32> -> vector<1x8xf32>
      %c0_84 = arith.constant 0 : index
      %c0_85 = arith.constant 0 : index
      %130 = vector.load %arg11[%c0_84, %c0_85] : memref<1x8xf32, #tpu.memory_space<vmem>>, vector<1x8xf32>
      %131 = arith.addf %129, %130 : vector<1x8xf32>
      %132 = vector.extract_strided_slice %123 {offsets = [0, 0], sizes = [8, 8], strides = [1, 1]} : vector<8x32xf32> to vector<8x8xf32>
      %cst_86 = arith.constant dense<0.000000e+00> : vector<1x8xf32>
      %133 = tpu.matmul %131, %132, %cst_86 {dimension_numbers = #tpu.dot_dimension_numbers<[1], [1], [0], [0], [0, 0, 1, 0], [], []>} : vector<1x8xf32>, vector<8x8xf32>, vector<1x8xf32> -> vector<1x8xf32>
      %c0_87 = arith.constant 0 : index
      %134 = memref.load %arg2[%c0_87] : memref<1xf32, #tpu.memory_space<smem>>
      %135 = vector.broadcast %134 : f32 to vector<1x8xf32>
      %136 = arith.addf %133, %135 : vector<1x8xf32>
      %137 = math.tanh %136 : vector<1x8xf32>
      %c0_88 = arith.constant 0 : index
      %c0_89 = arith.constant 0 : index
      %c0_90 = arith.constant 0 : index
      %138 = vector.load %arg16[%c0_88, %c0_89, %c0_90] : memref<4x1x8xf32, #tpu.memory_space<vmem>>, vector<1x1x8xf32>
      %139 = vector.shape_cast %138 : vector<1x1x8xf32> to vector<1x8xf32>
      %140 = vector.shape_cast %137 : vector<1x8xf32> to vector<1x1x8xf32>
      tpu.vector_store %arg16[%c0_88, %c0_89, %c0_90], %140 {strides = array<i32>} : memref<4x1x8xf32, #tpu.memory_space<vmem>>, vector<1x1x8xf32>,
      %141 = vector.extract_strided_slice %123 {offsets = [0, 8], sizes = [8, 8], strides = [1, 1]} : vector<8x32xf32> to vector<8x8xf32>
      %cst_91 = arith.constant dense<0.000000e+00> : vector<1x8xf32>
      %142 = tpu.matmul %131, %141, %cst_91 {dimension_numbers = #tpu.dot_dimension_numbers<[1], [1], [0], [0], [0, 0, 1, 0], [], []>} : vector<1x8xf32>, vector<8x8xf32>, vector<1x8xf32> -> vector<1x8xf32>
      %c0_92 = arith.constant 0 : index
      %143 = memref.load %arg2[%c0_92] : memref<1xf32, #tpu.memory_space<smem>>
      %144 = vector.broadcast %143 : f32 to vector<1x8xf32>
      %145 = arith.addf %142, %144 : vector<1x8xf32>
      %146 = math.tanh %145 : vector<1x8xf32>
      %c1_93 = arith.constant 1 : index
      %c0_94 = arith.constant 0 : index
      %c0_95 = arith.constant 0 : index
      %147 = vector.load %arg16[%c1_93, %c0_94, %c0_95] : memref<4x1x8xf32, #tpu.memory_space<vmem>>, vector<1x1x8xf32>
      %148 = vector.shape_cast %147 : vector<1x1x8xf32> to vector<1x8xf32>
      %149 = vector.shape_cast %146 : vector<1x8xf32> to vector<1x1x8xf32>
      tpu.vector_store %arg16[%c1_93, %c0_94, %c0_95], %149 {strides = array<i32>} : memref<4x1x8xf32, #tpu.memory_space<vmem>>, vector<1x1x8xf32>,
      %150 = vector.extract_strided_slice %123 {offsets = [0, 16], sizes = [8, 8], strides = [1, 1]} : vector<8x32xf32> to vector<8x8xf32>
      %cst_96 = arith.constant dense<0.000000e+00> : vector<1x8xf32>
      %151 = tpu.matmul %131, %150, %cst_96 {dimension_numbers = #tpu.dot_dimension_numbers<[1], [1], [0], [0], [0, 0, 1, 0], [], []>} : vector<1x8xf32>, vector<8x8xf32>, vector<1x8xf32> -> vector<1x8xf32>
      %c0_97 = arith.constant 0 : index
      %152 = memref.load %arg2[%c0_97] : memref<1xf32, #tpu.memory_space<smem>>
      %153 = vector.broadcast %152 : f32 to vector<1x8xf32>
      %154 = arith.addf %151, %153 : vector<1x8xf32>
      %155 = math.tanh %154 : vector<1x8xf32>
      %c2_98 = arith.constant 2 : index
      %c0_99 = arith.constant 0 : index
      %c0_100 = arith.constant 0 : index
      %156 = vector.load %arg16[%c2_98, %c0_99, %c0_100] : memref<4x1x8xf32, #tpu.memory_space<vmem>>, vector<1x1x8xf32>
      %157 = vector.shape_cast %156 : vector<1x1x8xf32> to vector<1x8xf32>
      %158 = vector.shape_cast %155 : vector<1x8xf32> to vector<1x1x8xf32>
      tpu.vector_store %arg16[%c2_98, %c0_99, %c0_100], %158 {strides = array<i32>} : memref<4x1x8xf32, #tpu.memory_space<vmem>>, vector<1x1x8xf32>,
      %159 = vector.extract_strided_slice %123 {offsets = [0, 24], sizes = [8, 8], strides = [1, 1]} : vector<8x32xf32> to vector<8x8xf32>
      %cst_101 = arith.constant dense<0.000000e+00> : vector<1x8xf32>
      %160 = tpu.matmul %131, %159, %cst_101 {dimension_numbers = #tpu.dot_dimension_numbers<[1], [1], [0], [0], [0, 0, 1, 0], [], []>} : vector<1x8xf32>, vector<8x8xf32>, vector<1x8xf32> -> vector<1x8xf32>
      %c0_102 = arith.constant 0 : index
      %161 = memref.load %arg2[%c0_102] : memref<1xf32, #tpu.memory_space<smem>>
      %162 = vector.broadcast %161 : f32 to vector<1x8xf32>
      %163 = arith.addf %160, %162 : vector<1x8xf32>
      %164 = math.tanh %163 : vector<1x8xf32>
      %c3_103 = arith.constant 3 : index
      %c0_104 = arith.constant 0 : index
      %c0_105 = arith.constant 0 : index
      %165 = vector.load %arg16[%c3_103, %c0_104, %c0_105] : memref<4x1x8xf32, #tpu.memory_space<vmem>>, vector<1x1x8xf32>
      %166 = vector.shape_cast %165 : vector<1x1x8xf32> to vector<1x8xf32>
      %167 = vector.shape_cast %164 : vector<1x8xf32> to vector<1x1x8xf32>
      tpu.vector_store %arg16[%c3_103, %c0_104, %c0_105], %167 {strides = array<i32>} : memref<4x1x8xf32, #tpu.memory_space<vmem>>, vector<1x1x8xf32>,
    } else {
    }
    %c0 = arith.constant 0 : index
    %c0_1 = arith.constant 0 : index
    %c0_2 = arith.constant 0 : index
    %3 = vector.load %arg3[%c0, %c0_1, %c0_2] : memref<1x8x32xf32, #tpu.memory_space<vmem>>, vector<1x8x32xf32>
    %4 = vector.shape_cast %3 : vector<1x8x32xf32> to vector<8x32xf32>
    %5 = arith.truncf %4 : vector<8x32xf32> to vector<8x32xbf16>
    %c0_3 = arith.constant 0 : index
    %c0_4 = arith.constant 0 : index
    %6 = vector.load %arg6[%c0_3, %c0_4] : memref<32x32xbf16, #tpu.memory_space<vmem>>, vector<32x32xbf16>
    %cst = arith.constant dense<0.000000e+00> : vector<8x32xf32>
    %7 = tpu.matmul %5, %6, %cst {dimension_numbers = #tpu.dot_dimension_numbers<[1], [0], [0], [1], [0, 0, 1, 1], [], []>} : vector<8x32xbf16>, vector<32x32xbf16>, vector<8x32xf32> -> vector<8x32xf32>
    %c0_5 = arith.constant 0 : index
    %c0_6 = arith.constant 0 : index
    %8 = vector.load %arg7[%c0_5, %c0_6] : memref<1x32xf32, #tpu.memory_space<vmem>>, vector<1x32xf32>
    %9 = vector.broadcast %8 : vector<1x32xf32> to vector<8x32xf32>
    %10 = arith.addf %7, %9 : vector<8x32xf32>
    %11 = arith.truncf %10 : vector<8x32xf32> to vector<8x32xbf16>
    %c0_7 = arith.constant 0 : index
    %c0_8 = arith.constant 0 : index
    %c0_9 = arith.constant 0 : index
    %12 = vector.load %arg13[%c0_7, %c0_8, %c0_9] : memref<1x8x8xf32, #tpu.memory_space<vmem>>, vector<1x8x8xf32>
    %13 = vector.shape_cast %12 : vector<1x8x8xf32> to vector<8x8xf32>
    %cst_10 = arith.constant 0.000000e+00 : f32
    %14 = vector.broadcast %cst_10 : f32 to vector<8x8xf32>
    %15 = arith.cmpf oeq, %13, %14 : vector<8x8xf32>
    %cst_11 = arith.constant -1.000000e+09 : f32
    %cst_12 = arith.constant 0.000000e+00 : f32
    %16 = vector.broadcast %cst_11 : f32 to vector<8x8xf32>
    %17 = vector.broadcast %cst_12 : f32 to vector<8x8xf32>
    %18 = arith.select %15, %16, %17 : vector<8x8xi1>, vector<8x8xf32>
    %c0_13 = arith.constant 0 : index
    %c0_14 = arith.constant 0 : index
    %19 = vector.load %arg15[%c0_13, %c0_14] : memref<8x32xbf16, #tpu.memory_space<vmem>>, vector<8x32xbf16>
    %20 = vector.extract_strided_slice %11 {offsets = [0, 0], sizes = [8, 8], strides = [1, 1]} : vector<8x32xbf16> to vector<8x8xbf16>
    %21 = vector.extract_strided_slice %19 {offsets = [0, 0], sizes = [8, 8], strides = [1, 1]} : vector<8x32xbf16> to vector<8x8xbf16>
    %cst_15 = arith.constant dense<0.000000e+00> : vector<8x8xf32>
    %22 = tpu.matmul %20, %21, %cst_15 {dimension_numbers = #tpu.dot_dimension_numbers<[1], [1], [0], [0], [0, 0, 1, 0], [], []>} : vector<8x8xbf16>, vector<8x8xbf16>, vector<8x8xf32> -> vector<8x8xf32>
    %c0_16 = arith.constant 0 : index
    %c0_17 = arith.constant 0 : index
    %c0_18 = arith.constant 0 : index
    %23 = vector.load %arg16[%c0_16, %c0_17, %c0_18] : memref<4x1x8xf32, #tpu.memory_space<vmem>>, vector<1x1x8xf32>
    %24 = vector.shape_cast %23 : vector<1x1x8xf32> to vector<1x8xf32>
    %25 = vector.broadcast %24 : vector<1x8xf32> to vector<8x8xf32>
    %26 = arith.addf %22, %25 : vector<8x8xf32>
    %27 = arith.addf %26, %18 : vector<8x8xf32>
    %c0_19 = arith.constant 0 : index
    %c0_20 = arith.constant 0 : index
    %c0_21 = arith.constant 0 : index
    %c0_22 = arith.constant 0 : index
    %28 = vector.load %arg12[%c0_19, %c0_20, %c0_21, %c0_22] : memref<1x4x8x8xf32, #tpu.memory_space<vmem>>, vector<1x1x8x8xf32>
    %29 = vector.shape_cast %28 : vector<1x1x8x8xf32> to vector<8x8xf32>
    %30 = arith.addf %27, %29 : vector<8x8xf32>
    %cst_23 = arith.constant dense<0xFF800000> : vector<8xf32>
    %31 = vector.multi_reduction <maximumf>, %30, %cst_23 [1] : vector<8x8xf32> to vector<8xf32>
    %32 = vector.shape_cast %31 : vector<8xf32> to vector<8x1xf32>
    %33 = vector.broadcast %32 : vector<8x1xf32> to vector<8x8xf32>
    %34 = arith.subf %30, %33 : vector<8x8xf32>
    %35 = math.exp %34 : vector<8x8xf32>
    %cst_24 = arith.constant dense<0.000000e+00> : vector<8xf32>
    %36 = vector.multi_reduction <add>, %35, %cst_24 [1] : vector<8x8xf32> to vector<8xf32>
    %37 = vector.shape_cast %36 : vector<8xf32> to vector<8x1xf32>
    %38 = tpu.reciprocal %37 {approx = true} : vector<8x1xf32> -> vector<8x1xf32>
    %39 = vector.broadcast %38 : vector<8x1xf32> to vector<8x8xf32>
    %40 = arith.mulf %35, %39 : vector<8x8xf32>
    %c0_25 = arith.constant 0 : index
    %c0_26 = arith.constant 0 : index
    %c0_27 = arith.constant 0 : index
    %c0_28 = arith.constant 0 : index
    %41 = vector.load %arg14[%c0_25, %c0_26, %c0_27, %c0_28] : memref<1x4x8x8xf32, #tpu.memory_space<vmem>>, vector<1x1x8x8xf32>
    %42 = vector.shape_cast %41 : vector<1x1x8x8xf32> to vector<8x8xf32>
    %43 = vector.shape_cast %40 : vector<8x8xf32> to vector<1x1x8x8xf32>
    tpu.vector_store %arg14[%c0_25, %c0_26, %c0_27, %c0_28], %43 {strides = array<i32>} : memref<1x4x8x8xf32, #tpu.memory_space<vmem>>, vector<1x1x8x8xf32>,
    %44 = vector.extract_strided_slice %11 {offsets = [0, 8], sizes = [8, 8], strides = [1, 1]} : vector<8x32xbf16> to vector<8x8xbf16>
    %45 = vector.extract_strided_slice %19 {offsets = [0, 8], sizes = [8, 8], strides = [1, 1]} : vector<8x32xbf16> to vector<8x8xbf16>
    %cst_29 = arith.constant dense<0.000000e+00> : vector<8x8xf32>
    %46 = tpu.matmul %44, %45, %cst_29 {dimension_numbers = #tpu.dot_dimension_numbers<[1], [1], [0], [0], [0, 0, 1, 0], [], []>} : vector<8x8xbf16>, vector<8x8xbf16>, vector<8x8xf32> -> vector<8x8xf32>
    %c1 = arith.constant 1 : index
    %c0_30 = arith.constant 0 : index
    %c0_31 = arith.constant 0 : index
    %47 = vector.load %arg16[%c1, %c0_30, %c0_31] : memref<4x1x8xf32, #tpu.memory_space<vmem>>, vector<1x1x8xf32>
    %48 = vector.shape_cast %47 : vector<1x1x8xf32> to vector<1x8xf32>
    %49 = vector.broadcast %48 : vector<1x8xf32> to vector<8x8xf32>
    %50 = arith.addf %46, %49 : vector<8x8xf32>
    %51 = arith.addf %50, %18 : vector<8x8xf32>
    %c0_32 = arith.constant 0 : index
    %c1_33 = arith.constant 1 : index
    %c0_34 = arith.constant 0 : index
    %c0_35 = arith.constant 0 : index
    %52 = vector.load %arg12[%c0_32, %c1_33, %c0_34, %c0_35] : memref<1x4x8x8xf32, #tpu.memory_space<vmem>>, vector<1x1x8x8xf32>
    %53 = vector.shape_cast %52 : vector<1x1x8x8xf32> to vector<8x8xf32>
    %54 = arith.addf %51, %53 : vector<8x8xf32>
    %cst_36 = arith.constant dense<0xFF800000> : vector<8xf32>
    %55 = vector.multi_reduction <maximumf>, %54, %cst_36 [1] : vector<8x8xf32> to vector<8xf32>
    %56 = vector.shape_cast %55 : vector<8xf32> to vector<8x1xf32>
    %57 = vector.broadcast %56 : vector<8x1xf32> to vector<8x8xf32>
    %58 = arith.subf %54, %57 : vector<8x8xf32>
    %59 = math.exp %58 : vector<8x8xf32>
    %cst_37 = arith.constant dense<0.000000e+00> : vector<8xf32>
    %60 = vector.multi_reduction <add>, %59, %cst_37 [1] : vector<8x8xf32> to vector<8xf32>
    %61 = vector.shape_cast %60 : vector<8xf32> to vector<8x1xf32>
    %62 = tpu.reciprocal %61 {approx = true} : vector<8x1xf32> -> vector<8x1xf32>
    %63 = vector.broadcast %62 : vector<8x1xf32> to vector<8x8xf32>
    %64 = arith.mulf %59, %63 : vector<8x8xf32>
    %c0_38 = arith.constant 0 : index
    %c1_39 = arith.constant 1 : index
    %c0_40 = arith.constant 0 : index
    %c0_41 = arith.constant 0 : index
    %65 = vector.load %arg14[%c0_38, %c1_39, %c0_40, %c0_41] : memref<1x4x8x8xf32, #tpu.memory_space<vmem>>, vector<1x1x8x8xf32>
    %66 = vector.shape_cast %65 : vector<1x1x8x8xf32> to vector<8x8xf32>
    %67 = vector.shape_cast %64 : vector<8x8xf32> to vector<1x1x8x8xf32>
    tpu.vector_store %arg14[%c0_38, %c1_39, %c0_40, %c0_41], %67 {strides = array<i32>} : memref<1x4x8x8xf32, #tpu.memory_space<vmem>>, vector<1x1x8x8xf32>,
    %68 = vector.extract_strided_slice %11 {offsets = [0, 16], sizes = [8, 8], strides = [1, 1]} : vector<8x32xbf16> to vector<8x8xbf16>
    %69 = vector.extract_strided_slice %19 {offsets = [0, 16], sizes = [8, 8], strides = [1, 1]} : vector<8x32xbf16> to vector<8x8xbf16>
    %cst_42 = arith.constant dense<0.000000e+00> : vector<8x8xf32>
    %70 = tpu.matmul %68, %69, %cst_42 {dimension_numbers = #tpu.dot_dimension_numbers<[1], [1], [0], [0], [0, 0, 1, 0], [], []>} : vector<8x8xbf16>, vector<8x8xbf16>, vector<8x8xf32> -> vector<8x8xf32>
    %c2 = arith.constant 2 : index
    %c0_43 = arith.constant 0 : index
    %c0_44 = arith.constant 0 : index
    %71 = vector.load %arg16[%c2, %c0_43, %c0_44] : memref<4x1x8xf32, #tpu.memory_space<vmem>>, vector<1x1x8xf32>
    %72 = vector.shape_cast %71 : vector<1x1x8xf32> to vector<1x8xf32>
    %73 = vector.broadcast %72 : vector<1x8xf32> to vector<8x8xf32>
    %74 = arith.addf %70, %73 : vector<8x8xf32>
    %75 = arith.addf %74, %18 : vector<8x8xf32>
    %c0_45 = arith.constant 0 : index
    %c2_46 = arith.constant 2 : index
    %c0_47 = arith.constant 0 : index
    %c0_48 = arith.constant 0 : index
    %76 = vector.load %arg12[%c0_45, %c2_46, %c0_47, %c0_48] : memref<1x4x8x8xf32, #tpu.memory_space<vmem>>, vector<1x1x8x8xf32>
    %77 = vector.shape_cast %76 : vector<1x1x8x8xf32> to vector<8x8xf32>
    %78 = arith.addf %75, %77 : vector<8x8xf32>
    %cst_49 = arith.constant dense<0xFF800000> : vector<8xf32>
    %79 = vector.multi_reduction <maximumf>, %78, %cst_49 [1] : vector<8x8xf32> to vector<8xf32>
    %80 = vector.shape_cast %79 : vector<8xf32> to vector<8x1xf32>
    %81 = vector.broadcast %80 : vector<8x1xf32> to vector<8x8xf32>
    %82 = arith.subf %78, %81 : vector<8x8xf32>
    %83 = math.exp %82 : vector<8x8xf32>
    %cst_50 = arith.constant dense<0.000000e+00> : vector<8xf32>
    %84 = vector.multi_reduction <add>, %83, %cst_50 [1] : vector<8x8xf32> to vector<8xf32>
    %85 = vector.shape_cast %84 : vector<8xf32> to vector<8x1xf32>
    %86 = tpu.reciprocal %85 {approx = true} : vector<8x1xf32> -> vector<8x1xf32>
    %87 = vector.broadcast %86 : vector<8x1xf32> to vector<8x8xf32>
    %88 = arith.mulf %83, %87 : vector<8x8xf32>
    %c0_51 = arith.constant 0 : index
    %c2_52 = arith.constant 2 : index
    %c0_53 = arith.constant 0 : index
    %c0_54 = arith.constant 0 : index
    %89 = vector.load %arg14[%c0_51, %c2_52, %c0_53, %c0_54] : memref<1x4x8x8xf32, #tpu.memory_space<vmem>>, vector<1x1x8x8xf32>
    %90 = vector.shape_cast %89 : vector<1x1x8x8xf32> to vector<8x8xf32>
    %91 = vector.shape_cast %88 : vector<8x8xf32> to vector<1x1x8x8xf32>
    tpu.vector_store %arg14[%c0_51, %c2_52, %c0_53, %c0_54], %91 {strides = array<i32>} : memref<1x4x8x8xf32, #tpu.memory_space<vmem>>, vector<1x1x8x8xf32>,
    %92 = vector.extract_strided_slice %11 {offsets = [0, 24], sizes = [8, 8], strides = [1, 1]} : vector<8x32xbf16> to vector<8x8xbf16>
    %93 = vector.extract_strided_slice %19 {offsets = [0, 24], sizes = [8, 8], strides = [1, 1]} : vector<8x32xbf16> to vector<8x8xbf16>
    %cst_55 = arith.constant dense<0.000000e+00> : vector<8x8xf32>
    %94 = tpu.matmul %92, %93, %cst_55 {dimension_numbers = #tpu.dot_dimension_numbers<[1], [1], [0], [0], [0, 0, 1, 0], [], []>} : vector<8x8xbf16>, vector<8x8xbf16>, vector<8x8xf32> -> vector<8x8xf32>
    %c3 = arith.constant 3 : index
    %c0_56 = arith.constant 0 : index
    %c0_57 = arith.constant 0 : index
    %95 = vector.load %arg16[%c3, %c0_56, %c0_57] : memref<4x1x8xf32, #tpu.memory_space<vmem>>, vector<1x1x8xf32>
    %96 = vector.shape_cast %95 : vector<1x1x8xf32> to vector<1x8xf32>
    %97 = vector.broadcast %96 : vector<1x8xf32> to vector<8x8xf32>
    %98 = arith.addf %94, %97 : vector<8x8xf32>
    %99 = arith.addf %98, %18 : vector<8x8xf32>
    %c0_58 = arith.constant 0 : index
    %c3_59 = arith.constant 3 : index
    %c0_60 = arith.constant 0 : index
    %c0_61 = arith.constant 0 : index
    %100 = vector.load %arg12[%c0_58, %c3_59, %c0_60, %c0_61] : memref<1x4x8x8xf32, #tpu.memory_space<vmem>>, vector<1x1x8x8xf32>
    %101 = vector.shape_cast %100 : vector<1x1x8x8xf32> to vector<8x8xf32>
    %102 = arith.addf %99, %101 : vector<8x8xf32>
    %cst_62 = arith.constant dense<0xFF800000> : vector<8xf32>
    %103 = vector.multi_reduction <maximumf>, %102, %cst_62 [1] : vector<8x8xf32> to vector<8xf32>
    %104 = vector.shape_cast %103 : vector<8xf32> to vector<8x1xf32>
    %105 = vector.broadcast %104 : vector<8x1xf32> to vector<8x8xf32>
    %106 = arith.subf %102, %105 : vector<8x8xf32>
    %107 = math.exp %106 : vector<8x8xf32>
    %cst_63 = arith.constant dense<0.000000e+00> : vector<8xf32>
    %108 = vector.multi_reduction <add>, %107, %cst_63 [1] : vector<8x8xf32> to vector<8xf32>
    %109 = vector.shape_cast %108 : vector<8xf32> to vector<8x1xf32>
    %110 = tpu.reciprocal %109 {approx = true} : vector<8x1xf32> -> vector<8x1xf32>
    %111 = vector.broadcast %110 : vector<8x1xf32> to vector<8x8xf32>
    %112 = arith.mulf %107, %111 : vector<8x8xf32>
    %c0_64 = arith.constant 0 : index
    %c3_65 = arith.constant 3 : index
    %c0_66 = arith.constant 0 : index
    %c0_67 = arith.constant 0 : index
    %113 = vector.load %arg14[%c0_64, %c3_65, %c0_66, %c0_67] : memref<1x4x8x8xf32, #tpu.memory_space<vmem>>, vector<1x1x8x8xf32>
    %114 = vector.shape_cast %113 : vector<1x1x8x8xf32> to vector<8x8xf32>
    %115 = vector.shape_cast %112 : vector<8x8xf32> to vector<1x1x8x8xf32>
    tpu.vector_store %arg14[%c0_64, %c3_65, %c0_66, %c0_67], %115 {strides = array<i32>} : memref<1x4x8x8xf32, #tpu.memory_space<vmem>>, vector<1x1x8x8xf32>,
    return
  }
  func.func @transform_0(%arg0: i32, %arg1: i32) -> i32 {
    %c0_i32 = arith.constant 0 : i32
    %c0_i32_0 = arith.constant 0 : i32
    return %c0_i32 : i32
  }
  func.func @transform_1(%arg0: i32, %arg1: i32) -> (i32, i32, i32) {
    %c0_i32 = arith.constant 0 : i32
    %c0_i32_0 = arith.constant 0 : i32
    return %arg0, %arg1, %c0_i32 : i32, i32, i32
  }
  func.func @transform_2(%arg0: i32, %arg1: i32) -> (i32, i32, i32) {
    %c0_i32 = arith.constant 0 : i32
    %c0_i32_0 = arith.constant 0 : i32
    %c0_i32_1 = arith.constant 0 : i32
    return %arg0, %c0_i32, %c0_i32_0 : i32, i32, i32
  }
  func.func @transform_3(%arg0: i32, %arg1: i32) -> (i32, i32, i32) {
    %c0_i32 = arith.constant 0 : i32
    %c0_i32_0 = arith.constant 0 : i32
    %c0_i32_1 = arith.constant 0 : i32
    return %arg0, %c0_i32, %c0_i32_0 : i32, i32, i32
  }
  func.func @transform_4(%arg0: i32, %arg1: i32) -> (i32, i32) {
    %c0_i32 = arith.constant 0 : i32
    %c0_i32_0 = arith.constant 0 : i32
    %c0_i32_1 = arith.constant 0 : i32
    return %c0_i32, %c0_i32_0 : i32, i32
  }
  func.func @transform_5(%arg0: i32, %arg1: i32) -> (i32, i32) {
    %c0_i32 = arith.constant 0 : i32
    %c0_i32_0 = arith.constant 0 : i32
    %c0_i32_1 = arith.constant 0 : i32
    return %c0_i32, %c0_i32_0 : i32, i32
  }
  func.func @transform_6(%arg0: i32, %arg1: i32) -> (i32, i32) {
    %c0_i32 = arith.constant 0 : i32
    %c0_i32_0 = arith.constant 0 : i32
    %c0_i32_1 = arith.constant 0 : i32
    return %c0_i32, %c0_i32_0 : i32, i32
  }
  func.func @transform_7(%arg0: i32, %arg1: i32) -> (i32, i32) {
    %c0_i32 = arith.constant 0 : i32
    %c0_i32_0 = arith.constant 0 : i32
    %c0_i32_1 = arith.constant 0 : i32
    return %c0_i32, %c0_i32_0 : i32, i32
  }
  func.func @transform_8(%arg0: i32, %arg1: i32) -> (i32, i32) {
    %c0_i32 = arith.constant 0 : i32
    %c0_i32_0 = arith.constant 0 : i32
    %c0_i32_1 = arith.constant 0 : i32
    return %c0_i32, %c0_i32_0 : i32, i32
  }
  func.func @transform_9(%arg0: i32, %arg1: i32) -> (i32, i32) {
    %c0_i32 = arith.constant 0 : i32
    %c0_i32_0 = arith.constant 0 : i32
    %c0_i32_1 = arith.constant 0 : i32
    return %c0_i32, %c0_i32_0 : i32, i32
  }
  func.func @transform_10(%arg0: i32, %arg1: i32) -> (i32, i32, i32, i32) {
    %c0_i32 = arith.constant 0 : i32
    %c0_i32_0 = arith.constant 0 : i32
    %c0_i32_1 = arith.constant 0 : i32
    return %arg0, %c0_i32, %arg1, %c0_i32_0 : i32, i32, i32, i32
  }
  func.func @transform_11(%arg0: i32, %arg1: i32) -> (i32, i32, i32) {
    %c0_i32 = arith.constant 0 : i32
    %c0_i32_0 = arith.constant 0 : i32
    return %arg0, %arg1, %c0_i32 : i32, i32, i32
  }
  func.func @transform_12(%arg0: i32, %arg1: i32) -> (i32, i32, i32, i32) {
    %c0_i32 = arith.constant 0 : i32
    %c0_i32_0 = arith.constant 0 : i32
    %c0_i32_1 = arith.constant 0 : i32
    return %arg0, %c0_i32, %arg1, %c0_i32_0 : i32, i32, i32, i32
  }
}

</mosaic_0001>

<bundles_post_ra>
// kernel: tpu_custom_call.1
= control target key start
LH: loop header
LB: loop body
LE: loop exit
PB: predicated region body
PF: predicated region fallthrough
CT: control target
= control target key end

     0   :  { %s2520_s0 = inlined_call_operand.<no memory space> [shape: f32[1], index: 0, kind: input, shape index: {}]   ;;  %s2521_s1 = inlined_call_operand.vmem [shape: f32[2,8,32], index: 1, kind: input, shape index: {}]   ;;  %s2522_s2 = inlined_call_operand.vmem [shape: f32[2,8,32], index: 2, kind: input, shape index: {}]   ;;  %s2523_s3 = inlined_call_operand.hbm [shape: f32[2,1,32], index: 3, kind: input, shape index: {}]   ;;  %s2524_s4 = inlined_call_operand.hbm [shape: bf16[32,32], index: 4, kind: input, shape index: {}]   ;;  %s2525_s5 = inlined_call_operand.vmem [shape: f32[1,32], index: 5, kind: input, shape index: {}]   ;;  %s2526_s6 = inlined_call_operand.vmem [shape: bf16[32,32], index: 6, kind: input, shape index: {}]   ;;  %s2527_s7 = inlined_call_operand.vmem [shape: f32[1,32], index: 7, kind: input, shape index: {}]   ;;  %s2528_s8 = inlined_call_operand.vmem [shape: f32[32,8], index: 8, kind: input, shape index: {}]   ;;  %s2529_s9 = inlined_call_operand.vmem [shape: f32[1,8], index: 9, kind: input, shape index: {}]   ;;  %s2530_s10 = inlined_call_operand.hbm [shape: f32[2,4,8,8], index: 10, kind: input, shape index: {}]   ;;  %s2531_s11 = inlined_call_operand.hbm [shape: f32[2,8,8], index: 11, kind: input, shape index: {}]   ;;  %s2532_s12 = inlined_call_operand.hbm [shape: f32[2,4,8,8], index: 12, kind: output, shape index: {}]  }
   0x1   :  { %2539 = sst [smem:[#allocation20_spill]] %s2523_s3 }
   0x2   :  { %2540 = sst [smem:[#allocation21_spill]] %s2525_s5 }
   0x3   :  { %2541 = sst [smem:[#allocation22_spill]] %s2530_s10 }
   0x4   :  { %2542 = sst [smem:[#allocation23_spill]] %s2531_s11 }
   0x5   :  { %2543 = sst [smem:[#allocation24_spill]] %s2532_s12 }
   0x6   :  { %17 = sst [smem:[#allocation4]] %s2520_s0 }
   0x7   :  { %18 = vsyncpa [#allocation6], 0 }
   0x8   :  { %20 = vsyncpa [#allocation6 + $0x1], 0 }
   0x9   :  { %21 = vsyncpa [#allocation9], 0 }
   0xa   :  { %22 = vsyncpa [#allocation7], 0 }
   0xb   :  { %24 = vsyncpa [#allocation7 + $0x1], 0  ;;  %s2162_s23 = smov 0   ;;  %s2164_s24 = smov 0  }
   0xc   :  { %s2166_s25 = smov 0   ;;  %s2168_s26 = smov 0  }
   0xd   :  { %s2170_s27 = smov 0   ;;  %s2172_s28 = smov 0  }
   0xe LB: > { %2544 = sst [smem:[#allocation17_spill]] %s2064_s25  ;;  %s42_s0 = sadd.s32 1, %s2072_s27  ;;  %s2076_s28 = sphi %s2172_s28, %s30_s28   ;;  %s2072_s27 = sphi %s2170_s27, %s2570_s27   ;;  %s2068_s26 = sphi %s2168_s26, %s2569_s26   ;;  %s2064_s25 = sphi %s2166_s25, %s2565_s25   ;;  %s2060_s24 = sphi %s2164_s24, %s2568_s24   ;;  %s2056_s23 = sphi %s2162_s23, %s2567_s23  }
   0xf   : > { %s124_s29 = sadd.s32 1, %s2064_s25  ;;  %p44_p0 = scmp.ge.s32.totalorder %s42_s0, 2 }
  0x10   : > { %p131_p1 = scmp.ne.s32.totalorder %s2064_s25, %s2060_s24  ;;  %p132_p2 = scmp.eq.s32.totalorder %s2076_s28, 0 }
  0x11   : > { %s2572_s0 = smov (%p44_p0, %s42_s0), 0  ;;  %p1786_p5 = scmp.lt.s32.totalorder %s2076_s28, 2 }
  0x12   : > { %2545 = sst [smem:[#allocation18_spill]] %s2572_s0  ;;  %p133_p4 = por %p132_p2, %p131_p1 }
  0x13   : > { %s121_s30 = ssub.s32 %s2072_s27, %s2572_s0  ;;  %s419_s13 = sand.u32 1, %s2076_s28  }
  0x14   : > { %p122_p6 = scmp.eq.s32.totalorder %s121_s30, 0  ;;  %s2208_s14 = sand.u32 1, %s2064_s25  }
  0x15   : > { %s1605_s15 = sshll.u32 %s2072_s27, 4  ;;  %s2547_s3 = sld [smem:[#allocation20_spill]] }
  0x16   : > { %s2212_s16 = scalar_select %p122_p6, %s2064_s25, %s124_s29  }
  0x17   : > { %s422_s20 = scalar_lea.vmem [#allocation5], %s2208_s14  ;;  %p2218_p7 = pnand %p1786_p5, %p133_p4 }
  0x18   : > { %2546 = sst [smem:[#allocation19_spill]] %s2212_s16  ;;  %s429_s21 = sshll.u32 %s422_s20, 4  ;;  %s430_s21 = int_to_ptr.vmem [resolvable:$true] %s429_s21 }
  0x19   : > { %s1606_s30 = sshll.u32 %s2208_s14, 5  ;;  %s2223_s0 = scalar_lea.sflag [#allocation6], %s419_s13 }
  0x1a   : > { %p2537_p8 = pneg %p2218_p7  ;;  %s1891_s29 = scalar_lea.vmem %s430_s21, 16 }
  0x1b   : > { %s427_s19 = scalar_lea.hbm %s2547_s3, %s1605_s15  ;;  %p1892_p9 = scmp.ne.s32.totalorder %s430_s21, %s1891_s29 }
  0x1c   : > { %s2078_s15 = smov [#allocation5]  }
  0x1d   : > { %p1894_p10 = pnand %p1892_p9, %p2537_p8  ;;  %s1896_s17 = sshll.u32 %s2078_s15, 4  ;;  %s1897_s17 = int_to_ptr.vmem [resolvable:$false] %s1896_s17 }
  0x1e   : > { %s1898_s18 = scalar_lea.vmem %s1897_s17, 32  ;;  %p1899_p12 = scmp.lt.s32.totalorder %s430_s21, %s1897_s17 }
  0x1f   : > { %p1895_p11 = pneg %p1894_p10  ;;  %p1900_p13 = scmp.lt.s32.totalorder %s1898_s18, %s1891_s29 }
  0x21   : > { %p1901_p0 = por %p1900_p13, %p1899_p12 }
  0x23   : > { %p1902_p2 = pnand %p1901_p0, %p1895_p11 }
  0x25   : > { %1905 = shalt.err (!%p1902_p2)
}
  0x26   : > { %1774 = dma.hbm_to_vmem [thread:$0]  (!%p2218_p7), %s427_s19, 16, %s430_s21, %s2223_s0  }
  0x27   : > { %s440_s13 = scalar_lea.vmem [#allocation10], %s1606_s30  ;;  %s1655_s3 = sshll.u32 %s2072_s27, 9 }
  0x28   : > { %s448_s20 = sshll.u32 %s440_s13, 4  ;;  %s2549_s10 = sld [smem:[#allocation22_spill]]  ;;  %s449_s20 = int_to_ptr.vmem [resolvable:$true] %s448_s20 }
  0x29   : > { %s1919_s5 = scalar_lea.vmem %s449_s20, 512  ;;  %s2079_s29 = smov [#allocation10]  }
  0x2a   : > { %p1920_p4 = scmp.ne.s32.totalorder %s449_s20, %s1919_s5  ;;  %s1924_s17 = sshll.u32 %s2079_s29, 4  ;;  %s1925_s17 = int_to_ptr.vmem [resolvable:$false] %s1924_s17 }
  0x2b   : > { %s1926_s18 = scalar_lea.vmem %s1925_s17, 1024  ;;  %p1927_p9 = scmp.lt.s32.totalorder %s449_s20, %s1925_s17 }
  0x2c   : > { %p1922_p5 = pnand %p1920_p4, %p2537_p8  ;;  %p1928_p10 = scmp.lt.s32.totalorder %s1926_s18, %s1919_s5 }
  0x2e   : > { %s447_s15 = scalar_lea.hbm %s2549_s10, %s1655_s3  ;;  %p1923_p6 = pneg %p1922_p5 }
  0x2f   : > { %p1929_p11 = por %p1928_p10, %p1927_p9 }
  0x31   : > { %p1930_p12 = pnand %p1929_p11, %p1923_p6 }
  0x33   : > { %1933 = shalt.err (!%p1930_p12)
}
  0x34   : > { %s2080_s19 = smov 128   ;;  %s2081_s3 = smov 8  }
  0x35   : > { %1777 = dma.hbm_to_vmem [thread:$0]  (!%p2218_p7), %s447_s15, 512, %s449_s20, %s2223_s0, %s2080_s19, %s2080_s19, %s2081_s3  }
  0x36   : > { %s2244_s12 = sadd.s32 4294967295, %s2076_s28   ;;  %s1601_s5 = sadd.s32 4294967294, %s2076_s28  }
  0x37   : > { %p137_p13 = scmp.ne.s32.totalorder %s2060_s24, %s2056_s23  ;;  %p2536_p0 = scmp.eq.s32.totalorder %s2244_s12, 0 }
  0x38   : > { %p345_p2 = scmp.eq.s32.totalorder %s2244_s12, 1  ;;  %p351_p4 = scmp.eq.s32.totalorder %s1601_s5, 1 }
  0x39   : > { %p2253_p5 = por %p2536_p0, %p137_p13  ;;  %p1602_p6 = scmp.ge.s32.totalorder %s2076_s28, 1 }
  0x3a   : > { %p2261_p9 = por %p345_p2, %p131_p1  ;;  %p2265_p10 = por %p351_p4, %p137_p13 }
  0x3b   : > { %p358_p11 = scmp.lt.s32.totalorder %s2076_s28, 3  ;;  %s2082_s20 = smov [#allocation8]  }
  0x3c   : > { %s2551_s21 = scalar_select %p2261_p9, 1, 0 }
  0x3d   : > { %s2552_s30 = scalar_select %p2265_p10, 1, 0 }
  0x3e   : > { %p2270_p12 = pnand %p1602_p6, %p358_p11  ;;  %s373_s15 = sshll.u32 %s2082_s20, 4  ;;  %s374_s15 = int_to_ptr.vmem [resolvable:$true] %s373_s15 }
  0x3f   : > { %s1609_s29 = sshll.u32 %s2208_s14, 3  ;;  %s1610_s17 = sshll.u32 %s2072_s27, 7 }
  0x40   : > { %p1767_p3 = pneg %p2270_p12  ;;  %s2555_s11 = sld [smem:[#allocation23_spill]] }
  0x41   : > { %s462_s10 = scalar_lea.vmem [#allocation11], %s1609_s29  ;;  %s1945_s20 = scalar_lea.vmem %s374_s15, 256 }
  0x42   : > { %p2280_p1 = pnand %p1767_p3, %p2536_p0  ;;  %s470_s25 = sshll.u32 %s462_s10, 4  ;;  %s471_s25 = int_to_ptr.vmem [resolvable:$true] %s470_s25 }
  0x43   : > { %p1946_p2 = scmp.ne.s32.totalorder %s374_s15, %s1945_s20  ;;  %p1953_p11 = scmp.lt.s32.totalorder %s374_s15, %s374_s15 }
  0x44   : > { %p1936_p13 = pneg %p2280_p1  ;;  %p1954_p3 = scmp.lt.s32.totalorder %s1945_s20, %s1945_s20 }
  0x46   : > { %s2287_s5 = scalar_lea.hbm %s2555_s11, %s1610_s17  ;;  %p1948_p4 = pnand %p1946_p2, %p1936_p13 }
  0x47   : > { %p1955_p0 = por %p1954_p3, %p1953_p11 }
  0x48   : > { %p1949_p6 = pneg %p1948_p4 }
  0x4a   : > { %p1956_p8 = pnand %p1955_p0, %p1949_p6 }
  0x4c   : > { %1959 = shalt.err (!%p1956_p8)
}
  0x4d   : > { %s2083_s14 = smov 64   ;;  %s2084_s19 = smov 4  }
  0x4e   : > { %1770 = dma.hbm_to_vmem [thread:$0]  (!%p2280_p1), %s2524_s4, 256, %s374_s15, [#allocation9], %s2083_s14, %s2083_s14, %s2084_s19  }
  0x4f   : > { %s1973_s10 = scalar_lea.vmem %s471_s25, 128  ;;  %p2556_p9 = pneg %p2218_p7 }
  0x50   : > { %p1974_p10 = scmp.ne.s32.totalorder %s471_s25, %s1973_s10  ;;  %s2085_s3 = smov [#allocation11]  }
  0x51   : > { %s1978_s20 = sshll.u32 %s2085_s3, 4  ;;  %s1979_s20 = int_to_ptr.vmem [resolvable:$false] %s1978_s20 }
  0x52   : > { %p1976_p13 = pnand %p1974_p10, %p2556_p9  ;;  %s1980_s11 = scalar_lea.vmem %s1979_s20, 256 }
  0x53   : > { %p1981_p8 = scmp.lt.s32.totalorder %s471_s25, %s1979_s20  ;;  %p1982_p0 = scmp.lt.s32.totalorder %s1980_s11, %s1973_s10 }
  0x54   : > { %p1977_p2 = pneg %p1976_p13 }
  0x55   : > { %p1983_p4 = por %p1982_p0, %p1981_p8 }
  0x57   : > { %p1984_p6 = pnand %p1983_p4, %p1977_p2 }
  0x59   : > { %1987 = shalt.err (!%p1984_p6)
}
  0x5a   : > { %1780 = dma.hbm_to_vmem [thread:$0]  (!%p2218_p7), %s2287_s5, 128, %s471_s25, %s2223_s0  }
  0x5b   : > { %479 = sbr.rel (%p2270_p12) target bundleno = 1283 (0x503), region = 68  ;;  %s481_s15 = sand.u32 (!%p2270_p12), 1, %s2244_s12  }
  0x5c   : > { %s2307_s18 = sand.u32 (!%p2270_p12), 1, %s2060_s24   ;;  %s482_s14 = scalar_lea.sflag (!%p2270_p12), [#allocation6], %s481_s15 }
  0x5d   : > { %s484_s11 = scalar_lea.vmem (!%p2270_p12), [#allocation5], %s2307_s18 }
  0x60   : > { %2039 = dma.done.wait (%p2253_p5), %s482_s14, 16  }
  0x61   : > { %2041 = vsyncadd (%p2253_p5), %s482_s14, 4294967280  ;;  %p2557_p9 = scmp.eq.s32.totalorder %s2244_s12, 0 }
  0x63   : > { %2043 = dma.done.wait (%p2557_p9), [#allocation9], 256   ;;  %p2558_p7 = pmov %p2557_p9 }
  0x64   : > { %s1613_s25 = sshll.u32 %s2307_s18, 5 }
  0x65   : > { %2045 = vsyncadd (%p2558_p7), [#allocation9], 4294967040  ;;  %s2321_s0 = scalar_lea.vmem [#allocation10], %s1613_s25 }
  0x66   : > { %2047 = dma.done.wait (%p2253_p5), %s482_s14, 640  }
  0x67   : > { %2049 = vsyncadd (%p2253_p5), %s482_s14, 4294966656  ;;  %p567_p10 = scmp.lt.s32.totalorder %s2068_s26, 1  ;;  %v2086_v0 = vmov 0.0   ;;  %vm2087_vm0 = vmmov 0   ;;  %v1849_v1 = vld [vmem:[%s2526_s6 + $0x8] sm:$0xff]   ;;  %v1850_v2 = vld [vmem:[%s2526_s6] sm:$0xff]  }
  0x68   : > { %1684 = vmatprep.subr.bf16.mxu0 %v2086_v0  ;;  %1688 = vmatprep.mubr.msk.bf16.mxu0 %vm2087_vm0, %v2086_v0  ;;  %v659_v4 = vld [vmem:[%s2528_s8 + $0x18] sm:$0xff]  ;;  %v658_v5 = vld [vmem:[%s2528_s8 + $0x10] sm:$0xff]  ;;  %v657_v6 = vld [vmem:[%s2528_s8 + $0x8] sm:$0xff]  ;;  %vm608_vm1 = vcmask 261120   ;;  %vm736_vm2 = vcmask 64512   ;;  %vm653_vm3 = vcmask 257024  }
  0x69   : > { %s2332_s22 = scalar_select %p567_p10, %s2068_s26, 1  ;;  %1692 = vmatprep.subr.mxu1 %v2086_v0  ;;  %1700 = vmatprep.mubr.msk.f32.mxu1 %vm2087_vm0, %v2086_v0  ;;  %v656_v8 = vld [vmem:[%s2528_s8] sm:$0xff]  ;;  %v1852_v24 = vld [vmem:[#allocation8 + $0x8] sm:$0xff]   ;;  %v1853_v27 = vld [vmem:[#allocation8] sm:$0xff]   ;;  %vm814_vm4 = vcmask 57344  }
  0x6a   : > { %1685 = vmatpush3.bf16.msra.mxu0 %v1849_v1  ;;  %1693 = vmatpush3.msra.mxu1 %v659_v4  ;;  %v655_v9 = vld [vmem:[%s484_s11] sm:$0x1]  ;;  %s2088_s3 = smov 104   ;;  %s2089_s20 = smov 112  }
  0x6b   : > { %s1616_s12 = sshll.u32 %s2332_s22, 3  ;;  %1686 = vmatprep.subr.bf16.mxu0 %v2086_v0  ;;  %1694 = vmatprep.subr.mxu1 %v2086_v0  ;;  %v1618_v10 = vld [vmem:[%s2527_s7] ss:$0 sm:$0xff]  ;;  %s2090_s15 = smov 120  }
  0x6c   : > { %s577_s5 = scalar_lea.vmem %s2522_s2, %s1616_s12  ;;  %1695 = vmatpush3.msra.mxu1 %v658_v5  ;;  %v660_v12 = vld [vmem:[%s2529_s9] sm:$0x1]  ;;  %s573_s13 = scalar_lea.vmem %s2521_s1, %s1616_s12 }
  0x6d   : > { %v583_v3 = vld [vmem:[%s577_s5] sm:$0xff]  ;;  %1696 = vmatprep.subr.mxu1 %v2086_v0  ;;  %s734_s22 = sld [smem:[#allocation4]]  ;;  %s1614_s17 = sshll.u32 %s2307_s18, 3 }
  0x6e   : > { %v584_v7 = vpack.c.bf16 %v583_v3, %v583_v3  ;;  %1687 = vmatpush3.bf16.msra.mxu0 %v1850_v2  ;;  %1697 = vmatpush3.msra.mxu1 %v657_v6  ;;  %v1053_v26 = vld [vmem:[%s573_s13] sm:$0xff]  ;;  %s2559_s19 = sld [smem:[#allocation21_spill]]  ;;  %s506_s29 = scalar_lea.vmem [#allocation11], %s1614_s17 }
  0x6f   : > { %1708 = vmatprep.subr.mxu0 %v2086_v0  ;;  %1698 = vmatprep.subr.mxu1 %v2086_v0  ;;  %v1054_v29 = vpack.c.bf16 %v1053_v26, %v1053_v26  ;;  %v1123_v1 = vld [vmem:[%s506_s29] sm:$0xff]  ;;  %s1656_s11 = sshll.u32 %s2068_s26, 9  ;;  %s1426_s14 = scalar_lea.sflag [#allocation7], %s2307_s18 }
  0x70   : > { %1699 = vmatpush3.msra.mxu1 %v656_v8  ;;  %vm1124_vm5 = vcmp.eq.f32.partialorder %v1123_v1, 0.0  ;;  %p2561_p12 = scmp.ne.s32.totalorder %s2551_s21, 0  ;;  %s2091_s26 = smov [#allocation12]  }
  0x71   : > { %1689 = vmatmul.mubr.msk.bf16.vlgmr.msra.gmra.mxu0 %vm608_vm1, %v584_v7  ;;  %1701 = vmatmul.mubr.msk.f32.vlgmr.msra.gmra.mxu1 %vm608_vm1, %v655_v9  ;;  %v1125_v2 = vsel %vm1124_vm5, -1e+09, %v2086_v0  ;;  %v1182_v7 = vld [vmem:[%s2321_s0] sm:$0xff]  ;;  %s1992_s13 = sshll.u32 %s2091_s26, 4  ;;  %s1993_s13 = int_to_ptr.vmem [resolvable:$false] %s1992_s13 }
  0x72   : > { %1703 = vmatprep.subr.mxu1 %v2086_v0  ;;  %1705 = vmatprep.mubr.msk.f32.mxu1 %vm2087_vm0, %v2086_v0 }
  0x73   : > { %1710 = vmatprep.mubr.msk.f32.mxu0 %vm2087_vm0, %v2086_v0  ;;  %v735_v33 = vstv %s734_s22  ;;  %s1994_s22 = scalar_lea.vmem %s1993_s13, 1024 }
  0x74   : > { %v1631_v44 = vld [vmem:[%s2559_s19] ss:$0 sm:$0xff] }
 0x131   : > { %v646_v11 = vpop.f32.mrf.mxu0  ;;  %v730_v14 = vpop.f32.mrf.mxu1 }
 0x132   : > { %v647_v13 = vadd.f32 %v1618_v10, %v646_v11  ;;  %v731_v17 = vadd.f32 %v730_v14, %v660_v12 }
 0x133   : > { %v1690_v15 = vpop.f32.mrf.mxu0  ;;  %v1702_v18 = vpop.f32.mrf.mxu1 }
 0x134   : > { %v652_v16 = vpack.c.bf16 %v647_v13, %v647_v13  ;;  %976 = vrot.lane.b32.xlu1 %v647_v13, %s2088_s3  ;;  %897 = vrot.lane.b32.xlu0 %v647_v13, %s2089_s20 }
 0x135   : > { %1704 = vmatpush3.xpose.msk.msra.mxu1 %vm736_vm2, %v647_v13  ;;  %v649_v19 = vpop.f32.mrf.mxu0 }
 0x136   : > { %654 = vst.msk [vmem:[#allocation2] sm:$0xf] %vm653_vm3, %v652_v16  ;;  %1713 = vmatprep.subr.mxu1 %v2086_v0 }
 0x137   : > { %v1691_v20 = vpop.f32.mrf.mxu0 }
 0x138   : > { %818 = vrot.lane.b32.xlu0 %v647_v13, %s2090_s15  ;;  %1706 = vmatmul.mubr.msk.f32.vlgmr.msra.gmra.mxu1 %vm736_vm2, %v731_v17  ;;  %v1640_v20 = vld [vmem:[%s2321_s0 + $0x8] sm:$0xff] }
 0x139   : > { %1715 = vmatprep.mubr.msk.f32.mxu1 %vm2087_vm0, %v2086_v0 }
 0x13d   : > { %v1126_v21 = vld [vmem:[#allocation2] sm:$0xf] }
 0x13e   : > { %v2389_v22 = vcombine.low %v1126_v21, %v1126_v21  ;;  %v1139_v31 = vsel %vm736_vm2, %v1126_v21, 0 }
 0x140   : > { %1210 = vrot.lane.b32.xlu1 %v2389_v22, %s2090_s15 }
 0x144   : > { %1285 = vrot.lane.b32.xlu1 %v2389_v22, %s2089_s20 }
 0x1a6   : > { %v898_v23 = vpop.permute.xlu0 %897  ;;  %v977_v28 = vpop.permute.xlu1 %976 }
 0x1a7   : > { %1714 = vmatpush3.xpose.msk.msra.mxu1 %vm736_vm2, %v898_v23 }
 0x1a8   : > { %1723 = vmatprep.subr.bf16.mxu1 %v2086_v0 }
 0x1aa   : > { %v819_v25 = vpop.permute.xlu0 %818  ;;  %1716 = vmatmul.mubr.msk.f32.vlgmr.msra.gmra.mxu1 %vm736_vm2, %v731_v17 }
 0x1ab   : > { %1709 = vmatpush3.xpose.msk.msra.mxu0 %vm736_vm2, %v819_v25  ;;  %1724 = vmatpush3.bf16.msra.mxu1 %v1852_v24  ;;  %v1644_v25 = vld [vmem:[%s2321_s0 + $0x10] sm:$0xff] }
 0x1ac   : > { %1718 = vmatprep.subr.mxu0 %v2086_v0  ;;  %1725 = vmatprep.subr.bf16.mxu1 %v2086_v0 }
 0x1ad   : > { %1727 = vmatprep.mubr.msk.bf16.mxu1 %vm2087_vm0, %v2086_v0 }
 0x1ae   : > { %1711 = vmatmul.mubr.msk.f32.vlgmr.msra.gmra.mxu0 %vm736_vm2, %v731_v17 }
 0x1af   : > { %1719 = vmatpush3.xpose.msk.msra.mxu0 %vm736_vm2, %v977_v28  ;;  %1726 = vmatpush3.bf16.msra.mxu1 %v1853_v27 }
 0x1b0   : > { %1720 = vmatprep.mubr.msk.f32.mxu0 %vm2087_vm0, %v2086_v0  ;;  %1731 = vmatprep.subr.bf16.mxu0 %v2086_v0 }
 0x1b1   : > { %1737 = vmatprep.subr.bf16.mxu1 %v2086_v0 }
 0x1b2   : > { %1721 = vmatmul.mubr.msk.f32.vlgmr.msra.gmra.mxu0 %vm736_vm2, %v731_v17  ;;  %1728 = vmatmul.mubr.msk.bf16.vlgmr.msra.gmra.mxu1 %vm608_vm1, %v1054_v29  ;;  %v1211_v30 = vpop.permute.xlu1 %1210 }
 0x1b3   : > { %v1216_v32 = vsel %vm736_vm2, %v1211_v30, 0  ;;  %1732 = vmatpush3.bf16.xpose.msra.mxu0 %v1139_v31  ;;  %1733 = vmatprep.mubr.msk.bf16.mxu0 %vm2087_vm0, %v2086_v0 }
 0x1b4   : > { %1738 = vmatpush3.bf16.xpose.msra.mxu1 %v1216_v32  ;;  %1743 = vmatprep.subr.bf16.mxu0 %v2086_v0 }
 0x1b5   : > { %1739 = vmatprep.mubr.msk.bf16.mxu1 %vm2087_vm0, %v2086_v0  ;;  %1749 = vmatprep.subr.bf16.mxu1 %v2086_v0 }
 0x1b6   : > { %v1286_v51 = vpop.permute.xlu1 %1285 }
 0x1b7   : > { %v1291_v54 = vsel %vm736_vm2, %v1286_v51, 0 }
 0x1f8   : > { %v809_v34 = vpop.f32.mrf.mxu1 }
 0x1f9   : > { %v810_v35 = vadd.f32 %v809_v34, %v735_v33 }
 0x1fa   : > { %v1707_v36 = vpop.f32.mrf.mxu1 }
 0x1fb   : > { %1854 = vtanh.f32 %v810_v35  ;;  %v1648_v36 = vld [vmem:[%s2321_s0 + $0x18] sm:$0xff]  ;;  %s566_s0 = scalar_lea.vmem [#allocation12], %s1613_s25 }
 0x1fc   : > { %s1440_s25 = sshll.u32 %s566_s0, 4  ;;  %s2471_s25 = int_to_ptr.vmem [resolvable:$true] %s1440_s25 }
 0x1fd   : > { %s1988_s16 = scalar_lea.vmem %s2471_s25, 512  ;;  %p1995_p3 = scmp.lt.s32.totalorder %s2471_s25, %s1993_s13 }
 0x1fe   : > { %p1989_p5 = scmp.ne.s32.totalorder %s2471_s25, %s1988_s16  ;;  %p1996_p13 = scmp.lt.s32.totalorder %s1994_s22, %s1988_s16 }
 0x200   : > { %p1990_p1 = pnand %p1989_p5, %p2561_p12  ;;  %p1997_p2 = por %p1996_p13, %p1995_p3 }
 0x202   : > { %p1991_p11 = pneg %p1990_p1 }
 0x204   : > { %p1998_p8 = pnand %p1997_p2, %p1991_p11 }
 0x208   : > { %v1855_v37 = vpop.eup %1854 }
 0x209   : > { %815 = vst.msk [vmem:[#allocation3] sm:$0x1] %vm814_vm4, %v1855_v37 }
 0x210   : > { %v1635_v3 = vld [vmem:[#allocation3] ss:$0 sm:$0xff] }
 0x26a   : > { %v967_v38 = vpop.f32.mrf.mxu1 }
 0x26b   : > { %v968_v39 = vadd.f32 %v967_v38, %v735_v33 }
 0x26c   : > { %v1717_v40 = vpop.f32.mrf.mxu1 }
 0x26d   : > { %1856 = vtanh.f32 %v968_v39 }
 0x26e   : > { %v888_v41 = vpop.f32.mrf.mxu0 }
 0x26f   : > { %v889_v42 = vadd.f32 %v888_v41, %v735_v33 }
 0x270   : > { %v1712_v43 = vpop.f32.mrf.mxu0 }
 0x271   : > { %1858 = vtanh.f32 %v889_v42 }
 0x272   : > { %v1046_v45 = vpop.f32.mrf.mxu0  ;;  %v1116_v46 = vpop.f32.mrf.mxu1 }
 0x273   : > { %v1047_v47 = vadd.f32 %v1046_v45, %v735_v33  ;;  %v1117_v48 = vadd.f32 %v1631_v44, %v1116_v46 }
 0x274   : > { %v1722_v49 = vpop.f32.mrf.mxu0  ;;  %v1729_v50 = vpop.f32.mrf.mxu1 }
 0x275   : > { %1860 = vtanh.f32 %v1047_v47  ;;  %v1122_v52 = vpack.c.bf16 %v1117_v48, %v1117_v48 }
 0x276   : > { %v1119_v53 = vpop.f32.mrf.mxu1 }
 0x277   : > { %1205 = vrot.lane.b32.xlu0 %v1122_v52, %s2090_s15  ;;  %1283 = vrot.lane.b32.xlu1 %v1122_v52, %s2089_s20  ;;  %s2560_s20 = sld [smem:[#allocation24_spill]] }
 0x278   : > { %1734 = vmatmul.mubr.msk.bf16.vlgmr.msra.gmra.mxu0 %vm736_vm2, %v1122_v52  ;;  %v1730_v55 = vpop.f32.mrf.mxu1 }
 0x279   : > { %1744 = vmatpush3.bf16.xpose.msra.mxu0 %v1291_v54  ;;  %1745 = vmatprep.mubr.msk.bf16.mxu0 %vm2087_vm0, %v2086_v0 }
 0x27a   : > { %v1857_v56 = vpop.eup %1856 }
 0x27b   : > { %973 = vst.msk [vmem:[#allocation3 + $0x2] sm:$0x1] %vm814_vm4, %v1857_v56  ;;  %1360 = vrot.lane.b32.xlu0 %v2389_v22, %s2088_s3 }
 0x27d   : > { %s2469_s15 = scalar_lea.hbm %s2560_s20, %s1656_s11 }
 0x27e   : > { %v1859_v57 = vpop.eup %1858 }
 0x27f   : > { %894 = vst.msk [vmem:[#allocation3 + $0x1] sm:$0x1] %vm814_vm4, %v1859_v57  ;;  %1358 = vrot.lane.b32.xlu0 %v1122_v52, %s2088_s3 }
 0x282   : > { %v1861_v58 = vpop.eup %1860  ;;  %v1642_v15 = vld [vmem:[#allocation3 + $0x2] ss:$0 sm:$0xff] }
 0x283   : > { %1052 = vst.msk [vmem:[#allocation3 + $0x3] sm:$0x1] %vm814_vm4, %v1861_v58 }
 0x286   : > { %v1637_v13 = vld [vmem:[#allocation3 + $0x1] ss:$0 sm:$0xff] }
 0x28a   : > { %v1646_v32 = vld [vmem:[#allocation3 + $0x3] ss:$0 sm:$0xff] }
 0x2e9   : > { %v1206_v59 = vpop.permute.xlu0 %1205  ;;  %v1284_v60 = vpop.permute.xlu1 %1283 }
 0x2ea   : > { %1740 = vmatmul.mubr.msk.bf16.vlgmr.msra.gmra.mxu1 %vm736_vm2, %v1206_v59  ;;  %1746 = vmatmul.mubr.msk.bf16.vlgmr.msra.gmra.mxu0 %vm736_vm2, %v1284_v60 }
 0x2eb   : > { %1751 = vmatprep.mubr.msk.bf16.mxu1 %vm2087_vm0, %v2086_v0 }
 0x2ed   : > { %v1361_v61 = vpop.permute.xlu0 %1360 }
 0x2ee   : > { %v1366_v62 = vsel %vm736_vm2, %v1361_v61, 0 }
 0x2ef   : > { %1750 = vmatpush3.bf16.xpose.msra.mxu1 %v1366_v62 }
 0x2f1   : > { %v1359_v63 = vpop.permute.xlu0 %1358 }
 0x2f6   : > { %1752 = vmatmul.mubr.msk.bf16.vlgmr.msra.gmra.mxu1 %vm736_vm2, %v1359_v63 }
 0x338   : > { %v1175_v4 = vpop.f32.mrf.mxu0 }
 0x339   : > { %v1176_v5 = vadd.f32 %v1635_v3, %v1175_v4 }
 0x33a   : > { %v1735_v6 = vpop.f32.mrf.mxu0 }
 0x33b   : > { %v1181_v8 = vadd.f32 %v1176_v5, %v1125_v2 }
 0x33c   : > { %v1178_v9 = vpop.f32.mrf.mxu0 }
 0x33d   : > { %v1183_v10 = vadd.f32 %v1182_v7, %v1181_v8 }
 0x33e   : > { %v1736_v11 = vpop.f32.mrf.mxu0 }
 0x33f   : > { %v1184_v12 = vsel %vm736_vm2, %v1183_v10, -inf }
 0x340   : > { %1185 = vmax.xlane.f32.xlu1 %v1184_v12 }
 0x3aa   : > { %v1252_v14 = vpop.f32.mrf.mxu1  ;;  %v1327_v16 = vpop.f32.mrf.mxu0 }
 0x3ab   : > { %v1253_v17 = vadd.f32 %v1637_v13, %v1252_v14  ;;  %v1328_v0 = vadd.f32 %v1642_v15, %v1327_v16 }
 0x3ac   : > { %v1741_v18 = vpop.f32.mrf.mxu1  ;;  %v1747_v19 = vpop.f32.mrf.mxu0 }
 0x3ad   : > { %v1258_v21 = vadd.f32 %v1253_v17, %v1125_v2  ;;  %v1333_v22 = vadd.f32 %v1328_v0, %v1125_v2 }
 0x3ae   : > { %v1255_v23 = vpop.f32.mrf.mxu1  ;;  %v1330_v24 = vpop.f32.mrf.mxu0 }
 0x3af   : > { %v1261_v26 = vadd.f32 %v1640_v20, %v1258_v21  ;;  %v1336_v30 = vadd.f32 %v1644_v25, %v1333_v22 }
 0x3b0   : > { %v1742_v27 = vpop.f32.mrf.mxu1  ;;  %v1748_v28 = vpop.f32.mrf.mxu0 }
 0x3b1   : > { %v1262_v29 = vsel %vm736_vm2, %v1261_v26, -inf  ;;  %v1337_v31 = vsel %vm736_vm2, %v1336_v30, -inf }
 0x3b2   : > { %1263 = vmax.xlane.f32.xlu0 %v1262_v29 }
 0x3b6   : > { %v1402_v33 = vpop.f32.mrf.mxu1  ;;  %1338 = vmax.xlane.f32.xlu0 %v1337_v31 }
 0x3b7   : > { %v1403_v34 = vadd.f32 %v1646_v32, %v1402_v33 }
 0x3b8   : > { %v1753_v35 = vpop.f32.mrf.mxu1 }
 0x3b9   : > { %v1408_v37 = vadd.f32 %v1403_v34, %v1125_v2 }
 0x3ba   : > { %v1405_v38 = vpop.f32.mrf.mxu1 }
 0x3bb   : > { %v1411_v39 = vadd.f32 %v1648_v36, %v1408_v37 }
 0x3bc   : > { %v1754_v40 = vpop.f32.mrf.mxu1 }
 0x3bd   : > { %v1412_v41 = vsel %vm736_vm2, %v1411_v39, -inf }
 0x3be   : > { %1413 = vmax.xlane.f32.xlu1 %v1412_v41 }
 0x3c9   : > { %v1186_v42 = vpop.xlane.xlu1 %1185 }
 0x3ca   : > { %v1187_v43 = vsub.f32 %v1183_v10, %v1186_v42 }
 0x3cc   : > { %v1188_v44 = vmul.f32 1.442695, %v1187_v43 }
 0x3ce   : > { %1862 = vpow2.f32 %v1188_v44 }
 0x3db   : > { %v1863_v45 = vpop.eup %1862 }
 0x3dc   : > { %v1190_v46 = vsel %vm736_vm2, %v1863_v45, 0.0 }
 0x3dd   : > { %1191 = vadd.xlane.f32.xlu0 %v1190_v46 }
 0x43b   : > { %v1264_v47 = vpop.xlane.xlu0 %1263 }
 0x43c   : > { %v1265_v48 = vsub.f32 %v1261_v26, %v1264_v47 }
 0x43e   : > { %v1266_v49 = vmul.f32 1.442695, %v1265_v48 }
 0x43f   : > { %v1339_v50 = vpop.xlane.xlu0 %1338 }
 0x440   : > { %1864 = vpow2.f32 %v1266_v49  ;;  %v1340_v51 = vsub.f32 %v1336_v30, %v1339_v50 }
 0x442   : > { %v1341_v52 = vmul.f32 1.442695, %v1340_v51 }
 0x444   : > { %1866 = vpow2.f32 %v1341_v52 }
 0x447   : > { %v1414_v53 = vpop.xlane.xlu1 %1413 }
 0x448   : > { %v1415_v54 = vsub.f32 %v1411_v39, %v1414_v53 }
 0x44a   : > { %v1416_v55 = vmul.f32 1.442695, %v1415_v54 }
 0x44c   : > { %1868 = vpow2.f32 %v1416_v55 }
 0x44d   : > { %v1865_v56 = vpop.eup %1864 }
 0x44e   : > { %v1268_v57 = vsel %vm736_vm2, %v1865_v56, 0.0 }
 0x44f   : > { %1269 = vadd.xlane.f32.xlu1 %v1268_v57 }
 0x451   : > { %v1867_v58 = vpop.eup %1866 }
 0x452   : > { %v1343_v59 = vsel %vm736_vm2, %v1867_v58, 0.0 }
 0x453   : > { %1344 = vadd.xlane.f32.xlu0 %v1343_v59 }
 0x459   : > { %v1869_v60 = vpop.eup %1868 }
 0x45a   : > { %v1418_v61 = vsel %vm736_vm2, %v1869_v60, 0.0 }
 0x45b   : > { %1419 = vadd.xlane.f32.xlu1 %v1418_v61 }
 0x466   : > { %v1192_v62 = vpop.xlane.xlu0 %1191 }
 0x467   : > { %1870 = vrcp.f32 %v1192_v62 }
 0x474   : > { %v1871_v63 = vpop.eup %1870 }
 0x475   : > { %v1194_v1 = vmul.f32 %v1871_v63, %v1863_v45 }
 0x477   : > { %1195 = vst.msk [vmem:[%s566_s0] sm:$0xff] %vm736_vm2, %v1194_v1 }
 0x4d8   : > { %v1270_v2 = vpop.xlane.xlu1 %1269 }
 0x4d9   : > { %1872 = vrcp.f32 %v1270_v2 }
 0x4dc   : > { %v1345_v3 = vpop.xlane.xlu0 %1344 }
 0x4dd   : > { %1874 = vrcp.f32 %v1345_v3 }
 0x4e4   : > { %v1420_v4 = vpop.xlane.xlu1 %1419 }
 0x4e5   : > { %1876 = vrcp.f32 %v1420_v4 }
 0x4e6   : > { %v1873_v5 = vpop.eup %1872 }
 0x4e7   : > { %v1272_v6 = vmul.f32 %v1873_v5, %v1865_v56 }
 0x4e9   : > { %1641 = vst.msk [vmem:[%s566_s0 + $0x8] sm:$0xff] %vm736_vm2, %v1272_v6 }
 0x4ea   : > { %v1875_v7 = vpop.eup %1874 }
 0x4eb   : > { %v1347_v8 = vmul.f32 %v1875_v7, %v1867_v58 }
 0x4ed   : > { %1645 = vst.msk [vmem:[%s566_s0 + $0x10] sm:$0xff] %vm736_vm2, %v1347_v8 }
 0x4f2   : > { %v1877_v9 = vpop.eup %1876 }
 0x4f3   : > { %v1422_v10 = vmul.f32 %v1877_v9, %v1869_v60 }
 0x4f5   : > { %1649 = vst.msk [vmem:[%s566_s0 + $0x18] sm:$0xff] %vm736_vm2, %v1422_v10 }
 0x4f6   : > { %2001 = shalt.err (!%p1998_p8)
}
 0x4f7   : > { %s2002_s12 = scalar_lea.hbm %s2469_s15, 512  ;;  %s2006_s17 = scalar_lea.hbm %s2560_s20, 1024 }
 0x4f8   : > { %p2003_p0 = scmp.ne.s32.totalorder %s2469_s15, %s2002_s12  ;;  %p2007_p9 = scmp.lt.s32.totalorder %s2469_s15, %s2560_s20 }
 0x4f9   : > { %p2008_p7 = scmp.lt.s32.totalorder %s2006_s17, %s2002_s12 }
 0x4fa   : > { %p2004_p4 = pnand %p2003_p0, %p2561_p12 }
 0x4fb   : > { %p2009_p10 = por %p2008_p7, %p2007_p9 }
 0x4fc   : > { %p2005_p6 = pneg %p2004_p4 }
 0x4fe   : > { %p2010_p5 = pnand %p2009_p10, %p2005_p6 }
 0x500   : > { %2013 = shalt.err (!%p2010_p5)
}
 0x501   : > { %s2092_s11 = smov 128   ;;  %s2093_s10 = smov 8  }
 0x502   : > { %1765 = dma.vmem_to_hbm [thread:$0]  (%p2561_p12), %s2471_s25, 512, %s2469_s15, %s1426_s14, %s2092_s11, %s2092_s11, %s2093_s10  }
 0x503 PF: > { %s1455_s3 = sand.u32 1, %s2056_s23   ;;  %p2562_p1 = scmp.ne.s32.totalorder %s2552_s30, 0 }
 0x504   : > { %p2563_p11 = scmp.ge.s32.totalorder %s2076_s28, 2  ;;  %s1456_s16 = scalar_lea.sflag [#allocation7], %s1455_s3 }
 0x506   : > { %p1782_p3 = pnand %p2563_p11, %p2562_p1 }
 0x508   : > { %p1783_p13 = pneg %p1782_p3 }
 0x50a   : > { %2051 = dma.done.wait (%p1783_p13), %s1456_s16, 512  }
 0x50b   : > { %2053 = vsyncadd (%p1783_p13), %s1456_s16, 4294966784  ;;  %s30_s28 = sadd.s32 1, %s2076_s28   ;;  %s2564_s26 = sld [smem:[#allocation17_spill]] }
 0x50c   : > { %p27_p2 = scmp.ge.s32.totalorder %s30_s28, 4   ;;  %s2565_s25 = sld [smem:[#allocation19_spill]] }
 0x50d   : > { %s2566_s21 = sld [smem:[#allocation18_spill]]  ;;  %s2567_s23 = smov %s2060_s24 }
 0x50f   :  { %29 = sbr.rel (!%p27_p2) target bundleno = 14 (0xe), region = 161 }
 0x511   : > { %s2568_s24 = smov %s2564_s26  ;;  %s2569_s26 = smov %s2072_s27 }
 0x513   : > { %s2570_s27 = smov %s2566_s21 }
 0x514   :  { %1461 = vsyncpa [#allocation6], 1 }
 0x515   :  { %1463 = vsyncpa [#allocation6 + $0x1], 1 }
 0x516   :  { %1464 = vsyncpa [#allocation9], 1 }
 0x517   :  { %1465 = vsyncpa [#allocation7], 1 }
 0x518   :  { %1467 = vsyncpa [#allocation7 + $0x1], 1 }

</bundles_post_ra>
